<compile_context>
chip_gen: v7x
topology: tpu7x:2x2x1
jax: 0.10.0
libtpu: 0.0.40
codegen_flags: <defaults>
</compile_context>

<pallas_src>
import functools

import numpy as np
import jax
import jax.numpy as jnp
from jax.experimental import pallas as pl
from jax.experimental.pallas import tpu as pltpu


# ----------------------------- fused Pallas kernel -----------------------------

def _residual_block_kernel(x_ref, w1_ref, b1_ref, g1_ref, be1_ref,
                           w2_ref, b2_ref, g2_ref, be2_ref,
                           w0_ref, b0_ref, o_ref, *, K, H, W, Cout, N):
    """conv1 -> BN1 -> LReLU -> conv2 -> BN2 -> LReLU -> conv0(x) residual add.

    Lane-packed layouts (channels minor inside each image column, images stacked on rows):
      x_ref  : (N*H, W*Cin)          f32
      w1_ref : (K*W*Cin,  W*Cout)    bf16  block-banded, kw pre-summed, kh stacked
      w2_ref : (K*W*Cout, W*Cout)    bf16
      w0_ref : (W*Cin,    W*Cout)    bf16  1x1 conv as block-diagonal
      b*/g*/be* : (1, W*Cout)        f32   per-channel params tiled to lanes
      o_ref  : (N*H, W*Cout)         f32
    """
    M = N * H
    WCo = W * Cout
    p = K // 2
    inv_count = 1.0 / float(N * H * W)

    def shifted_lhs(a):
        # a: (M, C) f32, rows packed per image (row period H).  Returns the (M, K*C) bf16
        # LHS whose kh-th lane block is `a` shifted by (kh - p) rows *within each image*
        # (zero rows outside the image -> 'same' zero padding along H).
        m, c = a.shape
        row = jax.lax.broadcasted_iota(jnp.int32, (m, c), 0)
        h = (row & (H - 1)) if (H & (H - 1)) == 0 else row % H
        pieces = []
        for kh in range(K):
            dh = kh - p
            if dh == 0:
                pieces.append(a)
                continue
            if dh > 0:
                sh = jnp.concatenate([a[dh:, :], jnp.zeros((dh, c), a.dtype)], axis=0)
            else:
                sh = jnp.concatenate([jnp.zeros((-dh, c), a.dtype), a[:m + dh, :]], axis=0)
            ok = jnp.logical_and(h + dh >= 0, h + dh < H)
            pieces.append(jnp.where(ok, sh, jnp.zeros_like(a)))
        # single bf16 cast of the whole wide LHS (MXU operand); one dot per conv.
        return jnp.concatenate(pieces, axis=1).astype(jnp.bfloat16)

    def channel_allreduce(v):
        # v: (1, W*Cout) f32, channel = lane % Cout.  Log-fold of lane rolls so every lane
        # ends up holding the sum over its channel's W lane positions.  Exact f32, runs on
        # the otherwise-idle XLU slot; result is independent of the roll direction.
        if (W & (W - 1)) == 0:
            shift = Cout
            while shift < WCo:
                v = v + pltpu.roll(v, shift=shift, axis=1)
                shift *= 2
            return v
        out = v
        for w in range(1, W):
            out = out + pltpu.roll(v, shift=w * Cout, axis=1)
        return out

    def bn_lrelu(acc, g, be):
        # Training-mode BatchNorm (biased batch variance, eps=1e-5) + LeakyReLU(0.01),
        # finalized in-kernel from the resident f32 accumulator.
        s1 = channel_allreduce(jnp.sum(acc, axis=0, keepdims=True))
        s2 = channel_allreduce(jnp.sum(acc * acc, axis=0, keepdims=True))
        mean = s1 * inv_count
        var = s2 * inv_count - mean * mean
        scale = g * jax.lax.rsqrt(var + 1e-5)
        shift = be - mean * scale
        z = acc * scale + shift
        return jnp.where(z > 0.0, z, 0.01 * z)

    x = x_ref[...]

    # conv1 (bias folded into the add) -> BN1 + LeakyReLU
    acc1 = jnp.dot(shifted_lhs(x), w1_ref[...],
                   preferred_element_type=jnp.float32) + b1_ref[...]
    a1 = bn_lrelu(acc1, g1_ref[...], be1_ref[...])

    # conv2 -> BN2 + LeakyReLU
    acc2 = jnp.dot(shifted_lhs(a1), w2_ref[...],
                   preferred_element_type=jnp.float32) + b2_ref[...]
    a2 = bn_lrelu(acc2, g2_ref[...], be2_ref[...])

    # 1x1 residual conv0(x) + add
    res = jnp.dot(x.astype(jnp.bfloat16), w0_ref[...],
                  preferred_element_type=jnp.float32) + b0_ref[...]
    o_ref[...] = a2 + res


# ----------------------------- weight packing -----------------------------

def _expand_conv_weight(w, W, K):
    """PyTorch (Cout, Cin, K, K) -> (K*W*Cin, W*Cout) bf16 block-banded weight.

    Per kh, all kw taps are pre-summed into one block-banded matrix (the kw bands are
    disjoint, so no weight values are actually added together), and the K per-kh matrices
    are stacked along the contraction axis to match the kernel's lane-concatenated
    row-shifted LHS -> each conv becomes a single wide MXU dot.  The width ('same') zero
    padding is folded in via the off-diagonal identity.
    """
    Cout, Cin = w.shape[0], w.shape[1]
    p = K // 2
    taps = jnp.transpose(w, (2, 3, 1, 0)).astype(jnp.float32)     # (K, K, Cin, Cout)
    per_kh = []
    for kh in range(K):
        m = jnp.zeros((W * Cin, W * Cout), jnp.float32)
        for kw in range(K):
            s = jnp.eye(W, k=-(kw - p), dtype=jnp.float32)        # width shift + boundary zeros
            m = m + jnp.kron(s, taps[kh, kw])
        per_kh.append(m)
    return jnp.concatenate(per_kh, axis=0).astype(jnp.bfloat16)


# ----------------------------- forward pass -----------------------------

def residual_block1_forward(params, x, *, kernel_size):
    K = kernel_size
    assert K % 2 == 1, "padding='same' path implemented for odd kernel sizes"
    N, Cin, H, W = x.shape
    Cout = params["b1"].shape[0]
    WCi, WCo = W * Cin, W * Cout
    M = N * H
    assert M % 8 == 0 and WCo % 128 == 0, "expects sublane/lane-dense packed shapes"

    # NCHW -> lane-packed (N*H, W*C) layout (boundary conversion only).
    xp = jnp.transpose(x, (0, 2, 3, 1)).reshape(M, WCi).astype(jnp.float32)

    w1e = _expand_conv_weight(params["w1"], W, K)                 # (K*WCi, WCo)
    w2e = _expand_conv_weight(params["w2"], W, K)                 # (K*WCo, WCo)
    w0e = jnp.kron(jnp.eye(W, dtype=jnp.float32),
                   jnp.transpose(params["w0"][:, :, 0, 0], (1, 0))).astype(jnp.bfloat16)

    def lane(v):                                                  # (Cout,) -> (1, W*Cout)
        return jnp.tile(v.astype(jnp.float32), W).reshape(1, WCo)

    kernel = functools.partial(_residual_block_kernel,
                               K=K, H=H, W=W, Cout=Cout, N=N)

    def full(shape):
        return pl.BlockSpec(shape, lambda i: (0,) * len(shape))

    out = pl.pallas_call(
        kernel,
        out_shape=jax.ShapeDtypeStruct((M, WCo), jnp.float32),
        # Single fused step: BN needs cross-image statistics and everything fits VMEM,
        # so the batch is not split across cores (avoids the per-core-stats trap on v7x).
        grid=(1,),
        in_specs=[full((M, WCi)),
                  full((K * WCi, WCo)), full((1, WCo)), full((1, WCo)), full((1, WCo)),
                  full((K * WCo, WCo)), full((1, WCo)), full((1, WCo)), full((1, WCo)),
                  full((WCi, WCo)), full((1, WCo))],
        out_specs=full((M, WCo)),
        compiler_params=pltpu.CompilerParams(dimension_semantics=("arbitrary",)),
    )(xp, w1e, lane(params["b1"]), lane(params["g1"]), lane(params["be1"]),
      w2e, lane(params["b2"]), lane(params["g2"]), lane(params["be2"]),
      w0e, lane(params["b0"]))

    # packed (N*H, W*Cout) -> NCHW (boundary conversion only).
    return jnp.transpose(out.reshape(N, H, W, Cout), (0, 3, 1, 2))


# ----------------------------- pure-JAX reference -----------------------------

def reference_forward(params, x, *, kernel_size):
    xn = jnp.transpose(x, (0, 2, 3, 1)).astype(jnp.float32)

    def conv(z, w, b):
        rhs = jnp.transpose(w, (2, 3, 1, 0))                      # HWIO
        out = jax.lax.conv_general_dilated(
            z, rhs, window_strides=(1, 1), padding="SAME",
            dimension_numbers=("NHWC", "HWIO", "NHWC"),
            precision=jax.lax.Precision.HIGHEST)
        return out + b[None, None, None, :]

    def bn_lrelu(z, g, be):
        m = jnp.mean(z, axis=(0, 1, 2), keepdims=True)
        v = jnp.mean((z - m) ** 2, axis=(0, 1, 2), keepdims=True)
        z = (z - m) * jax.lax.rsqrt(v + 1e-5) * g + be
        return jnp.where(z > 0.0, z, 0.01 * z)

    y = bn_lrelu(conv(xn, params["w1"], params["b1"]), params["g1"], params["be1"])
    y = bn_lrelu(conv(y, params["w2"], params["b2"]), params["g2"], params["be2"])
    out = conv(xn, params["w0"], params["b0"]) + y
    return jnp.transpose(out, (0, 3, 1, 2))


# ----------------------------- main -----------------------------

if __name__ == "__main__":
    N, Cin, Cout, K = 2, 4, 8, 3
    H = W = 16                         # W * Cout = 128 -> lane-dense blocks

    key = jax.random.PRNGKey(0)
    ks = jax.random.split(key, 11)
    params = {
        "w0": 0.1 * jax.random.normal(ks[0], (Cout, Cin, 1, 1), jnp.float32),
        "b0": 0.1 * jax.random.normal(ks[1], (Cout,), jnp.float32),
        "w1": 0.1 * jax.random.normal(ks[2], (Cout, Cin, K, K), jnp.float32),
        "b1": 0.1 * jax.random.normal(ks[3], (Cout,), jnp.float32),
        "g1": 1.0 + 0.1 * jax.random.normal(ks[4], (Cout,), jnp.float32),
        "be1": 0.1 * jax.random.normal(ks[5], (Cout,), jnp.float32),
        "w2": 0.1 * jax.random.normal(ks[6], (Cout, Cout, K, K), jnp.float32),
        "b2": 0.1 * jax.random.normal(ks[7], (Cout,), jnp.float32),
        "g2": 1.0 + 0.1 * jax.random.normal(ks[8], (Cout,), jnp.float32),
        "be2": 0.1 * jax.random.normal(ks[9], (Cout,), jnp.float32),
    }
    x = jax.random.normal(ks[10], (N, Cin, H, W), jnp.float32)

    fwd = jax.jit(functools.partial(residual_block1_forward, kernel_size=K))
    out = jax.block_until_ready(fwd(params, x))

    ref = jax.block_until_ready(reference_forward(params, x, kernel_size=K))

    assert out.shape == (N, Cout, H, W), out.shape
    # bf16 MXU operands (f32 accumulation) -> slightly looser tolerance than pure f32.
    np.testing.assert_allclose(np.asarray(out), np.asarray(ref), rtol=2e-2, atol=2e-2)
    print("KERNEL_OK")
</pallas_src>

<mosaic_0001>
module attributes {stable_mosaic.version = 11 : i64} {
  func.func @_residual_block_kernel(%arg0: i32, %arg1: memref<32x64xf32, #tpu.memory_space<vmem>>, %arg2: memref<192x128xbf16, #tpu.memory_space<vmem>>, %arg3: memref<1x128xf32, #tpu.memory_space<vmem>>, %arg4: memref<1x128xf32, #tpu.memory_space<vmem>>, %arg5: memref<1x128xf32, #tpu.memory_space<vmem>>, %arg6: memref<384x128xbf16, #tpu.memory_space<vmem>>, %arg7: memref<1x128xf32, #tpu.memory_space<vmem>>, %arg8: memref<1x128xf32, #tpu.memory_space<vmem>>, %arg9: memref<1x128xf32, #tpu.memory_space<vmem>>, %arg10: memref<64x128xbf16, #tpu.memory_space<vmem>>, %arg11: memref<1x128xf32, #tpu.memory_space<vmem>>, %arg12: memref<32x128xf32, #tpu.memory_space<vmem>>) attributes {dimension_semantics = [#tpu.dimension_semantics<arbitrary>], iteration_bounds = array<i64: 1>, scalar_prefetch = 0 : i64, scratch_operands = 0 : i64, tpu.core_type = #tpu.core_type<tc>, window_params = [{pipeline_mode = #tpu.pipeline_mode<synchronous>, transform_indices = @transform_0, window_bounds = array<i64: 32, 64>}, {pipeline_mode = #tpu.pipeline_mode<synchronous>, transform_indices = @transform_1, window_bounds = array<i64: 192, 128>}, {pipeline_mode = #tpu.pipeline_mode<synchronous>, transform_indices = @transform_2, window_bounds = array<i64: 1, 128>}, {pipeline_mode = #tpu.pipeline_mode<synchronous>, transform_indices = @transform_3, window_bounds = array<i64: 1, 128>}, {pipeline_mode = #tpu.pipeline_mode<synchronous>, transform_indices = @transform_4, window_bounds = array<i64: 1, 128>}, {pipeline_mode = #tpu.pipeline_mode<synchronous>, transform_indices = @transform_5, window_bounds = array<i64: 384, 128>}, {pipeline_mode = #tpu.pipeline_mode<synchronous>, transform_indices = @transform_6, window_bounds = array<i64: 1, 128>}, {pipeline_mode = #tpu.pipeline_mode<synchronous>, transform_indices = @transform_7, window_bounds = array<i64: 1, 128>}, {pipeline_mode = #tpu.pipeline_mode<synchronous>, transform_indices = @transform_8, window_bounds = array<i64: 1, 128>}, {pipeline_mode = #tpu.pipeline_mode<synchronous>, transform_indices = @transform_9, window_bounds = array<i64: 64, 128>}, {pipeline_mode = #tpu.pipeline_mode<synchronous>, transform_indices = @transform_10, window_bounds = array<i64: 1, 128>}, {pipeline_mode = #tpu.pipeline_mode<synchronous>, transform_indices = @transform_11, window_bounds = array<i64: 32, 128>}]} {
    %c0 = arith.constant 0 : index
    %c0_0 = arith.constant 0 : index
    %0 = vector.load %arg1[%c0, %c0_0] : memref<32x64xf32, #tpu.memory_space<vmem>>, vector<32x64xf32>
    %1 = tpu.iota {dimensions = array<i32: 0>} : vector<32x64xi32>
    %c15_i32 = arith.constant 15 : i32
    %2 = vector.broadcast %c15_i32 : i32 to vector<32x64xi32>
    %3 = arith.andi %1, %2 : vector<32x64xi32>
    %cst = arith.constant 0.000000e+00 : f32
    %4 = vector.broadcast %cst : f32 to vector<1x64xf32>
    %5 = vector.extract_strided_slice %0 {offsets = [0, 0], sizes = [31, 64], strides = [1, 1]} : vector<32x64xf32> to vector<31x64xf32>
    %6 = tpu.concatenate %4, %5 in 0 : vector<1x64xf32>, vector<31x64xf32> -> vector<32x64xf32>
    %c-1_i32 = arith.constant -1 : i32
    %7 = vector.broadcast %c-1_i32 : i32 to vector<32x64xi32>
    %8 = arith.addi %3, %7 : vector<32x64xi32>
    %c0_i32 = arith.constant 0 : i32
    %9 = vector.broadcast %c0_i32 : i32 to vector<32x64xi32>
    %10 = arith.cmpi sge, %8, %9 : vector<32x64xi32>
    %c-1_i32_1 = arith.constant -1 : i32
    %11 = vector.broadcast %c-1_i32_1 : i32 to vector<32x64xi32>
    %12 = arith.addi %3, %11 : vector<32x64xi32>
    %c16_i32 = arith.constant 16 : i32
    %13 = vector.broadcast %c16_i32 : i32 to vector<32x64xi32>
    %14 = arith.cmpi slt, %12, %13 : vector<32x64xi32>
    %15 = arith.andi %10, %14 : vector<32x64xi1>
    %cst_2 = arith.constant 0.000000e+00 : f32
    %16 = vector.broadcast %cst_2 : f32 to vector<32x64xf32>
    %17 = arith.select %15, %6, %16 : vector<32x64xi1>, vector<32x64xf32>
    %18 = vector.extract_strided_slice %0 {offsets = [1, 0], sizes = [31, 64], strides = [1, 1]} : vector<32x64xf32> to vector<31x64xf32>
    %cst_3 = arith.constant 0.000000e+00 : f32
    %19 = vector.broadcast %cst_3 : f32 to vector<1x64xf32>
    %20 = tpu.concatenate %18, %19 in 0 : vector<31x64xf32>, vector<1x64xf32> -> vector<32x64xf32>
    %c1_i32 = arith.constant 1 : i32
    %21 = vector.broadcast %c1_i32 : i32 to vector<32x64xi32>
    %22 = arith.addi %3, %21 : vector<32x64xi32>
    %c0_i32_4 = arith.constant 0 : i32
    %23 = vector.broadcast %c0_i32_4 : i32 to vector<32x64xi32>
    %24 = arith.cmpi sge, %22, %23 : vector<32x64xi32>
    %c1_i32_5 = arith.constant 1 : i32
    %25 = vector.broadcast %c1_i32_5 : i32 to vector<32x64xi32>
    %26 = arith.addi %3, %25 : vector<32x64xi32>
    %c16_i32_6 = arith.constant 16 : i32
    %27 = vector.broadcast %c16_i32_6 : i32 to vector<32x64xi32>
    %28 = arith.cmpi slt, %26, %27 : vector<32x64xi32>
    %29 = arith.andi %24, %28 : vector<32x64xi1>
    %cst_7 = arith.constant 0.000000e+00 : f32
    %30 = vector.broadcast %cst_7 : f32 to vector<32x64xf32>
    %31 = arith.select %29, %20, %30 : vector<32x64xi1>, vector<32x64xf32>
    %32 = tpu.concatenate %17, %0, %31 in 1 : vector<32x64xf32>, vector<32x64xf32>, vector<32x64xf32> -> vector<32x192xf32>
    %33 = arith.truncf %32 : vector<32x192xf32> to vector<32x192xbf16>
    %c0_8 = arith.constant 0 : index
    %c0_9 = arith.constant 0 : index
    %34 = vector.load %arg2[%c0_8, %c0_9] : memref<192x128xbf16, #tpu.memory_space<vmem>>, vector<192x128xbf16>
    %cst_10 = arith.constant dense<0.000000e+00> : vector<32x128xf32>
    %35 = tpu.matmul %33, %34, %cst_10 {dimension_numbers = #tpu.dot_dimension_numbers<[1], [0], [0], [1], [0, 0, 1, 1], [], []>} : vector<32x192xbf16>, vector<192x128xbf16>, vector<32x128xf32> -> vector<32x128xf32>
    %c0_11 = arith.constant 0 : index
    %c0_12 = arith.constant 0 : index
    %36 = vector.load %arg3[%c0_11, %c0_12] : memref<1x128xf32, #tpu.memory_space<vmem>>, vector<1x128xf32>
    %37 = vector.broadcast %36 : vector<1x128xf32> to vector<32x128xf32>
    %38 = arith.addf %35, %37 : vector<32x128xf32>
    %c0_13 = arith.constant 0 : index
    %c0_14 = arith.constant 0 : index
    %39 = vector.load %arg4[%c0_13, %c0_14] : memref<1x128xf32, #tpu.memory_space<vmem>>, vector<1x128xf32>
    %c0_15 = arith.constant 0 : index
    %c0_16 = arith.constant 0 : index
    %40 = vector.load %arg5[%c0_15, %c0_16] : memref<1x128xf32, #tpu.memory_space<vmem>>, vector<1x128xf32>
    %cst_17 = arith.constant dense<0.000000e+00> : vector<128xf32>
    %41 = vector.multi_reduction <add>, %38, %cst_17 [0] : vector<32x128xf32> to vector<128xf32>
    %42 = vector.shape_cast %41 : vector<128xf32> to vector<1x128xf32>
    %c8_i32 = arith.constant 8 : i32
    %43 = tpu.dynamic_rotate %42 by %c8_i32 dim 1 : vector<1x128xf32>, i32 -> vector<1x128xf32>
    %44 = arith.addf %42, %43 : vector<1x128xf32>
    %c16_i32_18 = arith.constant 16 : i32
    %45 = tpu.dynamic_rotate %44 by %c16_i32_18 dim 1 : vector<1x128xf32>, i32 -> vector<1x128xf32>
    %46 = arith.addf %44, %45 : vector<1x128xf32>
    %c32_i32 = arith.constant 32 : i32
    %47 = tpu.dynamic_rotate %46 by %c32_i32 dim 1 : vector<1x128xf32>, i32 -> vector<1x128xf32>
    %48 = arith.addf %46, %47 : vector<1x128xf32>
    %c64_i32 = arith.constant 64 : i32
    %49 = tpu.dynamic_rotate %48 by %c64_i32 dim 1 : vector<1x128xf32>, i32 -> vector<1x128xf32>
    %50 = arith.addf %48, %49 : vector<1x128xf32>
    %51 = arith.mulf %38, %38 : vector<32x128xf32>
    %cst_19 = arith.constant dense<0.000000e+00> : vector<128xf32>
    %52 = vector.multi_reduction <add>, %51, %cst_19 [0] : vector<32x128xf32> to vector<128xf32>
    %53 = vector.shape_cast %52 : vector<128xf32> to vector<1x128xf32>
    %c8_i32_20 = arith.constant 8 : i32
    %54 = tpu.dynamic_rotate %53 by %c8_i32_20 dim 1 : vector<1x128xf32>, i32 -> vector<1x128xf32>
    %55 = arith.addf %53, %54 : vector<1x128xf32>
    %c16_i32_21 = arith.constant 16 : i32
    %56 = tpu.dynamic_rotate %55 by %c16_i32_21 dim 1 : vector<1x128xf32>, i32 -> vector<1x128xf32>
    %57 = arith.addf %55, %56 : vector<1x128xf32>
    %c32_i32_22 = arith.constant 32 : i32
    %58 = tpu.dynamic_rotate %57 by %c32_i32_22 dim 1 : vector<1x128xf32>, i32 -> vector<1x128xf32>
    %59 = arith.addf %57, %58 : vector<1x128xf32>
    %c64_i32_23 = arith.constant 64 : i32
    %60 = tpu.dynamic_rotate %59 by %c64_i32_23 dim 1 : vector<1x128xf32>, i32 -> vector<1x128xf32>
    %61 = arith.addf %59, %60 : vector<1x128xf32>
    %cst_24 = arith.constant 0.001953125 : f32
    %62 = vector.broadcast %cst_24 : f32 to vector<1x128xf32>
    %63 = arith.mulf %50, %62 : vector<1x128xf32>
    %cst_25 = arith.constant 0.001953125 : f32
    %64 = vector.broadcast %cst_25 : f32 to vector<1x128xf32>
    %65 = arith.mulf %61, %64 : vector<1x128xf32>
    %66 = arith.mulf %63, %63 : vector<1x128xf32>
    %67 = arith.subf %65, %66 : vector<1x128xf32>
    %cst_26 = arith.constant 9.99999974E-6 : f32
    %68 = vector.broadcast %cst_26 : f32 to vector<1x128xf32>
    %69 = arith.addf %67, %68 : vector<1x128xf32>
    %70 = math.rsqrt %69 : vector<1x128xf32>
    %71 = arith.mulf %39, %70 : vector<1x128xf32>
    %72 = arith.mulf %63, %71 : vector<1x128xf32>
    %73 = arith.subf %40, %72 : vector<1x128xf32>
    %74 = vector.broadcast %71 : vector<1x128xf32> to vector<32x128xf32>
    %75 = arith.mulf %38, %74 : vector<32x128xf32>
    %76 = vector.broadcast %73 : vector<1x128xf32> to vector<32x128xf32>
    %77 = arith.addf %75, %76 : vector<32x128xf32>
    %cst_27 = arith.constant 0.000000e+00 : f32
    %78 = vector.broadcast %cst_27 : f32 to vector<32x128xf32>
    %79 = arith.cmpf ogt, %77, %78 : vector<32x128xf32>
    %cst_28 = arith.constant 0.00999999977 : f32
    %80 = vector.broadcast %cst_28 : f32 to vector<32x128xf32>
    %81 = arith.mulf %80, %77 : vector<32x128xf32>
    %82 = arith.select %79, %77, %81 : vector<32x128xi1>, vector<32x128xf32>
    %83 = tpu.iota {dimensions = array<i32: 0>} : vector<32x128xi32>
    %c15_i32_29 = arith.constant 15 : i32
    %84 = vector.broadcast %c15_i32_29 : i32 to vector<32x128xi32>
    %85 = arith.andi %83, %84 : vector<32x128xi32>
    %cst_30 = arith.constant 0.000000e+00 : f32
    %86 = vector.broadcast %cst_30 : f32 to vector<1x128xf32>
    %87 = vector.extract_strided_slice %82 {offsets = [0, 0], sizes = [31, 128], strides = [1, 1]} : vector<32x128xf32> to vector<31x128xf32>
    %88 = tpu.concatenate %86, %87 in 0 : vector<1x128xf32>, vector<31x128xf32> -> vector<32x128xf32>
    %c-1_i32_31 = arith.constant -1 : i32
    %89 = vector.broadcast %c-1_i32_31 : i32 to vector<32x128xi32>
    %90 = arith.addi %85, %89 : vector<32x128xi32>
    %c0_i32_32 = arith.constant 0 : i32
    %91 = vector.broadcast %c0_i32_32 : i32 to vector<32x128xi32>
    %92 = arith.cmpi sge, %90, %91 : vector<32x128xi32>
    %c-1_i32_33 = arith.constant -1 : i32
    %93 = vector.broadcast %c-1_i32_33 : i32 to vector<32x128xi32>
    %94 = arith.addi %85, %93 : vector<32x128xi32>
    %c16_i32_34 = arith.constant 16 : i32
    %95 = vector.broadcast %c16_i32_34 : i32 to vector<32x128xi32>
    %96 = arith.cmpi slt, %94, %95 : vector<32x128xi32>
    %97 = arith.andi %92, %96 : vector<32x128xi1>
    %cst_35 = arith.constant 0.000000e+00 : f32
    %98 = vector.broadcast %cst_35 : f32 to vector<32x128xf32>
    %99 = arith.select %97, %88, %98 : vector<32x128xi1>, vector<32x128xf32>
    %100 = vector.extract_strided_slice %82 {offsets = [1, 0], sizes = [31, 128], strides = [1, 1]} : vector<32x128xf32> to vector<31x128xf32>
    %cst_36 = arith.constant 0.000000e+00 : f32
    %101 = vector.broadcast %cst_36 : f32 to vector<1x128xf32>
    %102 = tpu.concatenate %100, %101 in 0 : vector<31x128xf32>, vector<1x128xf32> -> vector<32x128xf32>
    %c1_i32_37 = arith.constant 1 : i32
    %103 = vector.broadcast %c1_i32_37 : i32 to vector<32x128xi32>
    %104 = arith.addi %85, %103 : vector<32x128xi32>
    %c0_i32_38 = arith.constant 0 : i32
    %105 = vector.broadcast %c0_i32_38 : i32 to vector<32x128xi32>
    %106 = arith.cmpi sge, %104, %105 : vector<32x128xi32>
    %c1_i32_39 = arith.constant 1 : i32
    %107 = vector.broadcast %c1_i32_39 : i32 to vector<32x128xi32>
    %108 = arith.addi %85, %107 : vector<32x128xi32>
    %c16_i32_40 = arith.constant 16 : i32
    %109 = vector.broadcast %c16_i32_40 : i32 to vector<32x128xi32>
    %110 = arith.cmpi slt, %108, %109 : vector<32x128xi32>
    %111 = arith.andi %106, %110 : vector<32x128xi1>
    %cst_41 = arith.constant 0.000000e+00 : f32
    %112 = vector.broadcast %cst_41 : f32 to vector<32x128xf32>
    %113 = arith.select %111, %102, %112 : vector<32x128xi1>, vector<32x128xf32>
    %114 = tpu.concatenate %99, %82, %113 in 1 : vector<32x128xf32>, vector<32x128xf32>, vector<32x128xf32> -> vector<32x384xf32>
    %115 = arith.truncf %114 : vector<32x384xf32> to vector<32x384xbf16>
    %c0_42 = arith.constant 0 : index
    %c0_43 = arith.constant 0 : index
    %116 = vector.load %arg6[%c0_42, %c0_43] : memref<384x128xbf16, #tpu.memory_space<vmem>>, vector<384x128xbf16>
    %cst_44 = arith.constant dense<0.000000e+00> : vector<32x128xf32>
    %117 = tpu.matmul %115, %116, %cst_44 {dimension_numbers = #tpu.dot_dimension_numbers<[1], [0], [0], [1], [0, 0, 1, 1], [], []>} : vector<32x384xbf16>, vector<384x128xbf16>, vector<32x128xf32> -> vector<32x128xf32>
    %c0_45 = arith.constant 0 : index
    %c0_46 = arith.constant 0 : index
    %118 = vector.load %arg7[%c0_45, %c0_46] : memref<1x128xf32, #tpu.memory_space<vmem>>, vector<1x128xf32>
    %119 = vector.broadcast %118 : vector<1x128xf32> to vector<32x128xf32>
    %120 = arith.addf %117, %119 : vector<32x128xf32>
    %c0_47 = arith.constant 0 : index
    %c0_48 = arith.constant 0 : index
    %121 = vector.load %arg8[%c0_47, %c0_48] : memref<1x128xf32, #tpu.memory_space<vmem>>, vector<1x128xf32>
    %c0_49 = arith.constant 0 : index
    %c0_50 = arith.constant 0 : index
    %122 = vector.load %arg9[%c0_49, %c0_50] : memref<1x128xf32, #tpu.memory_space<vmem>>, vector<1x128xf32>
    %cst_51 = arith.constant dense<0.000000e+00> : vector<128xf32>
    %123 = vector.multi_reduction <add>, %120, %cst_51 [0] : vector<32x128xf32> to vector<128xf32>
    %124 = vector.shape_cast %123 : vector<128xf32> to vector<1x128xf32>
    %c8_i32_52 = arith.constant 8 : i32
    %125 = tpu.dynamic_rotate %124 by %c8_i32_52 dim 1 : vector<1x128xf32>, i32 -> vector<1x128xf32>
    %126 = arith.addf %124, %125 : vector<1x128xf32>
    %c16_i32_53 = arith.constant 16 : i32
    %127 = tpu.dynamic_rotate %126 by %c16_i32_53 dim 1 : vector<1x128xf32>, i32 -> vector<1x128xf32>
    %128 = arith.addf %126, %127 : vector<1x128xf32>
    %c32_i32_54 = arith.constant 32 : i32
    %129 = tpu.dynamic_rotate %128 by %c32_i32_54 dim 1 : vector<1x128xf32>, i32 -> vector<1x128xf32>
    %130 = arith.addf %128, %129 : vector<1x128xf32>
    %c64_i32_55 = arith.constant 64 : i32
    %131 = tpu.dynamic_rotate %130 by %c64_i32_55 dim 1 : vector<1x128xf32>, i32 -> vector<1x128xf32>
    %132 = arith.addf %130, %131 : vector<1x128xf32>
    %133 = arith.mulf %120, %120 : vector<32x128xf32>
    %cst_56 = arith.constant dense<0.000000e+00> : vector<128xf32>
    %134 = vector.multi_reduction <add>, %133, %cst_56 [0] : vector<32x128xf32> to vector<128xf32>
    %135 = vector.shape_cast %134 : vector<128xf32> to vector<1x128xf32>
    %c8_i32_57 = arith.constant 8 : i32
    %136 = tpu.dynamic_rotate %135 by %c8_i32_57 dim 1 : vector<1x128xf32>, i32 -> vector<1x128xf32>
    %137 = arith.addf %135, %136 : vector<1x128xf32>
    %c16_i32_58 = arith.constant 16 : i32
    %138 = tpu.dynamic_rotate %137 by %c16_i32_58 dim 1 : vector<1x128xf32>, i32 -> vector<1x128xf32>
    %139 = arith.addf %137, %138 : vector<1x128xf32>
    %c32_i32_59 = arith.constant 32 : i32
    %140 = tpu.dynamic_rotate %139 by %c32_i32_59 dim 1 : vector<1x128xf32>, i32 -> vector<1x128xf32>
    %141 = arith.addf %139, %140 : vector<1x128xf32>
    %c64_i32_60 = arith.constant 64 : i32
    %142 = tpu.dynamic_rotate %141 by %c64_i32_60 dim 1 : vector<1x128xf32>, i32 -> vector<1x128xf32>
    %143 = arith.addf %141, %142 : vector<1x128xf32>
    %cst_61 = arith.constant 0.001953125 : f32
    %144 = vector.broadcast %cst_61 : f32 to vector<1x128xf32>
    %145 = arith.mulf %132, %144 : vector<1x128xf32>
    %cst_62 = arith.constant 0.001953125 : f32
    %146 = vector.broadcast %cst_62 : f32 to vector<1x128xf32>
    %147 = arith.mulf %143, %146 : vector<1x128xf32>
    %148 = arith.mulf %145, %145 : vector<1x128xf32>
    %149 = arith.subf %147, %148 : vector<1x128xf32>
    %cst_63 = arith.constant 9.99999974E-6 : f32
    %150 = vector.broadcast %cst_63 : f32 to vector<1x128xf32>
    %151 = arith.addf %149, %150 : vector<1x128xf32>
    %152 = math.rsqrt %151 : vector<1x128xf32>
    %153 = arith.mulf %121, %152 : vector<1x128xf32>
    %154 = arith.mulf %145, %153 : vector<1x128xf32>
    %155 = arith.subf %122, %154 : vector<1x128xf32>
    %156 = vector.broadcast %153 : vector<1x128xf32> to vector<32x128xf32>
    %157 = arith.mulf %120, %156 : vector<32x128xf32>
    %158 = vector.broadcast %155 : vector<1x128xf32> to vector<32x128xf32>
    %159 = arith.addf %157, %158 : vector<32x128xf32>
    %cst_64 = arith.constant 0.000000e+00 : f32
    %160 = vector.broadcast %cst_64 : f32 to vector<32x128xf32>
    %161 = arith.cmpf ogt, %159, %160 : vector<32x128xf32>
    %cst_65 = arith.constant 0.00999999977 : f32
    %162 = vector.broadcast %cst_65 : f32 to vector<32x128xf32>
    %163 = arith.mulf %162, %159 : vector<32x128xf32>
    %164 = arith.select %161, %159, %163 : vector<32x128xi1>, vector<32x128xf32>
    %165 = arith.truncf %0 : vector<32x64xf32> to vector<32x64xbf16>
    %c0_66 = arith.constant 0 : index
    %c0_67 = arith.constant 0 : index
    %166 = vector.load %arg10[%c0_66, %c0_67] : memref<64x128xbf16, #tpu.memory_space<vmem>>, vector<64x128xbf16>
    %cst_68 = arith.constant dense<0.000000e+00> : vector<32x128xf32>
    %167 = tpu.matmul %165, %166, %cst_68 {dimension_numbers = #tpu.dot_dimension_numbers<[1], [0], [0], [1], [0, 0, 1, 1], [], []>} : vector<32x64xbf16>, vector<64x128xbf16>, vector<32x128xf32> -> vector<32x128xf32>
    %c0_69 = arith.constant 0 : index
    %c0_70 = arith.constant 0 : index
    %168 = vector.load %arg11[%c0_69, %c0_70] : memref<1x128xf32, #tpu.memory_space<vmem>>, vector<1x128xf32>
    %169 = vector.broadcast %168 : vector<1x128xf32> to vector<32x128xf32>
    %170 = arith.addf %167, %169 : vector<32x128xf32>
    %171 = arith.addf %164, %170 : vector<32x128xf32>
    %c0_71 = arith.constant 0 : index
    %c0_72 = arith.constant 0 : index
    %172 = vector.load %arg12[%c0_71, %c0_72] : memref<32x128xf32, #tpu.memory_space<vmem>>, vector<32x128xf32>
    tpu.vector_store %arg12[%c0_71, %c0_72], %171 {strides = array<i32>} : memref<32x128xf32, #tpu.memory_space<vmem>>, vector<32x128xf32>,
    return
  }
  func.func @transform_0(%arg0: i32) -> (i32, i32) {
    %c0_i32 = arith.constant 0 : i32
    %c0_i32_0 = arith.constant 0 : i32
    %c0_i32_1 = arith.constant 0 : i32
    return %c0_i32, %c0_i32_0 : i32, i32
  }
  func.func @transform_1(%arg0: i32) -> (i32, i32) {
    %c0_i32 = arith.constant 0 : i32
    %c0_i32_0 = arith.constant 0 : i32
    %c0_i32_1 = arith.constant 0 : i32
    return %c0_i32, %c0_i32_0 : i32, i32
  }
  func.func @transform_2(%arg0: i32) -> (i32, i32) {
    %c0_i32 = arith.constant 0 : i32
    %c0_i32_0 = arith.constant 0 : i32
    %c0_i32_1 = arith.constant 0 : i32
    return %c0_i32, %c0_i32_0 : i32, i32
  }
  func.func @transform_3(%arg0: i32) -> (i32, i32) {
    %c0_i32 = arith.constant 0 : i32
    %c0_i32_0 = arith.constant 0 : i32
    %c0_i32_1 = arith.constant 0 : i32
    return %c0_i32, %c0_i32_0 : i32, i32
  }
  func.func @transform_4(%arg0: i32) -> (i32, i32) {
    %c0_i32 = arith.constant 0 : i32
    %c0_i32_0 = arith.constant 0 : i32
    %c0_i32_1 = arith.constant 0 : i32
    return %c0_i32, %c0_i32_0 : i32, i32
  }
  func.func @transform_5(%arg0: i32) -> (i32, i32) {
    %c0_i32 = arith.constant 0 : i32
    %c0_i32_0 = arith.constant 0 : i32
    %c0_i32_1 = arith.constant 0 : i32
    return %c0_i32, %c0_i32_0 : i32, i32
  }
  func.func @transform_6(%arg0: i32) -> (i32, i32) {
    %c0_i32 = arith.constant 0 : i32
    %c0_i32_0 = arith.constant 0 : i32
    %c0_i32_1 = arith.constant 0 : i32
    return %c0_i32, %c0_i32_0 : i32, i32
  }
  func.func @transform_7(%arg0: i32) -> (i32, i32) {
    %c0_i32 = arith.constant 0 : i32
    %c0_i32_0 = arith.constant 0 : i32
    %c0_i32_1 = arith.constant 0 : i32
    return %c0_i32, %c0_i32_0 : i32, i32
  }
  func.func @transform_8(%arg0: i32) -> (i32, i32) {
    %c0_i32 = arith.constant 0 : i32
    %c0_i32_0 = arith.constant 0 : i32
    %c0_i32_1 = arith.constant 0 : i32
    return %c0_i32, %c0_i32_0 : i32, i32
  }
  func.func @transform_9(%arg0: i32) -> (i32, i32) {
    %c0_i32 = arith.constant 0 : i32
    %c0_i32_0 = arith.constant 0 : i32
    %c0_i32_1 = arith.constant 0 : i32
    return %c0_i32, %c0_i32_0 : i32, i32
  }
  func.func @transform_10(%arg0: i32) -> (i32, i32) {
    %c0_i32 = arith.constant 0 : i32
    %c0_i32_0 = arith.constant 0 : i32
    %c0_i32_1 = arith.constant 0 : i32
    return %c0_i32, %c0_i32_0 : i32, i32
  }
  func.func @transform_11(%arg0: i32) -> (i32, i32) {
    %c0_i32 = arith.constant 0 : i32
    %c0_i32_0 = arith.constant 0 : i32
    %c0_i32_1 = arith.constant 0 : i32
    return %c0_i32, %c0_i32_0 : i32, i32
  }
}

</mosaic_0001>

<bundles_post_ra>
// kernel: tile.38
= control target key start
LH: loop header
LB: loop body
LE: loop exit
PB: predicated region body
PF: predicated region fallthrough
CT: control target
= control target key end

     0   :  { %s28_s0 = inlined_call_operand.vmem [shape: f32[8], index: 0, kind: input, shape index: {}]   ;;  %s29_s1 = inlined_call_operand.vmem [shape: f32[16,8], index: 1, kind: output, shape index: {}]  }
   0x1   :  { %v4_v0 = vld [vmem:[%s28_s0] ss:$0 sm:$0xff] }
   0x2   :  { %5 = vst [vmem:[%s29_s1] sm:$0xff] %v4_v0  ;;  %8 = vst [vmem:[%s29_s1 + $0x8] sm:$0xff] %v4_v0 }

// kernel: tile.39
= control target key start
LH: loop header
LB: loop body
LE: loop exit
PB: predicated region body
PF: predicated region fallthrough
CT: control target
= control target key end

     0   :  { %s131_s10 = smov 120   ;;  %s132_s11 = smov 104   ;;  %vm3_vm0 = vcmask 64512   ;;  %vm9_vm1 = vcmask 1048512   ;;  %vm15_vm2 = vcmask 982912   ;;  %vm21_vm3 = vcmask 917312   ;;  %s207_s0 = inlined_call_operand.vmem [shape: f32[16,8], index: 0, kind: input, shape index: {}]   ;;  %s208_s1 = inlined_call_operand.vmem [shape: f32[1,128], index: 1, kind: output, shape index: {}]  }
   0x1   :  { %v101_v0 = vld [vmem:[%s207_s0 + $0xf] sm:$0x1]   ;;  %v103_v1 = vld [vmem:[%s207_s0 + $0xd] sm:$0x1]   ;;  %v102_v2 = vld [vmem:[%s207_s0 + $0xe] sm:$0x1]  }
   0x2   :  { %7 = vrot.lane.b32.xlu0 %v101_v0, %s131_s10  ;;  %19 = vrot.lane.b32.xlu1 %v103_v1, %s132_s11  ;;  %v104_v3 = vld [vmem:[%s207_s0 + $0xc] sm:$0x1]   ;;  %s133_s16 = smov 112   ;;  %s134_s17 = smov 96   ;;  %v105_v4 = vld [vmem:[%s207_s0 + $0xb] sm:$0x1]  }
   0x3   :  { %v106_v5 = vld [vmem:[%s207_s0 + $0xa] sm:$0x1]   ;;  %v2_v6 = vld [vmem:[%s207_s0] sm:$0x1]   ;;  %s135_s24 = smov 88   ;;  %s136_s25 = smov 80  }
   0x4   :  { %4 = vst.msk [vmem:[#allocation0] sm:$0x1] %vm3_vm0, %v2_v6   ;;  %v107_v7 = vld [vmem:[%s207_s0 + $0x9] sm:$0x1]   ;;  %v108_v8 = vld [vmem:[%s207_s0 + $0x8] sm:$0x1]  }
   0x5   :  { %s137_s30 = smov 72   ;;  %s138_s2 = smov 64   ;;  %v109_v9 = vld [vmem:[%s207_s0 + $0x7] sm:$0x1]   ;;  %v110_v10 = vld [vmem:[%s207_s0 + $0x6] sm:$0x1]  }
   0x6   :  { %13 = vrot.lane.b32.xlu0 %v102_v2, %s133_s16  ;;  %25 = vrot.lane.b32.xlu1 %v104_v3, %s134_s17  ;;  %s139_s7 = smov 56   ;;  %s140_s8 = smov 48   ;;  %v111_v11 = vld [vmem:[%s207_s0 + $0x5] sm:$0x1]   ;;  %v112_v12 = vld [vmem:[%s207_s0 + $0x4] sm:$0x1]  }
   0x7   :  { %s141_s13 = smov 40   ;;  %s142_s14 = smov 32   ;;  %v113_v13 = vld [vmem:[%s207_s0 + $0x3] sm:$0x1]   ;;  %v114_v14 = vld [vmem:[%s207_s0 + $0x2] sm:$0x1]  }
   0x8   :  { %s143_s19 = smov 24   ;;  %s144_s20 = smov 16   ;;  %v115_v15 = vld [vmem:[%s207_s0 + $0x1] sm:$0x1]   ;;  %vm27_vm4 = vcmask 851712   ;;  %vm33_vm5 = vcmask 786112  }
   0x9   :  { %s145_s0 = smov 8   ;;  %vm39_vm6 = vcmask 720512   ;;  %vm45_vm7 = vcmask 654912   ;;  %vm51_vm8 = vcmask 589312   ;;  %vm57_vm9 = vcmask 523712  }
   0xa   :  { %31 = vrot.lane.b32.xlu0 %v105_v4, %s135_s24  ;;  %37 = vrot.lane.b32.xlu1 %v106_v5, %s136_s25  ;;  %vm63_vm10 = vcmask 458112   ;;  %vm69_vm11 = vcmask 392512   ;;  %vm75_vm12 = vcmask 326912   ;;  %vm81_vm13 = vcmask 261312  }
   0xb   :  { %vm87_vm14 = vcmask 195712   ;;  %vm93_vm15 = vcmask 130112  }
   0xe   :  { %43 = vrot.lane.b32.xlu0 %v107_v7, %s137_s30  ;;  %49 = vrot.lane.b32.xlu1 %v108_v8, %s138_s2 }
  0x12   :  { %55 = vrot.lane.b32.xlu0 %v109_v9, %s139_s7  ;;  %61 = vrot.lane.b32.xlu1 %v110_v10, %s140_s8 }
  0x16   :  { %67 = vrot.lane.b32.xlu0 %v111_v11, %s141_s13  ;;  %73 = vrot.lane.b32.xlu1 %v112_v12, %s142_s14 }
  0x1a   :  { %79 = vrot.lane.b32.xlu0 %v113_v13, %s143_s19  ;;  %85 = vrot.lane.b32.xlu1 %v114_v14, %s144_s20 }
  0x1e   :  { %91 = vrot.lane.b32.xlu0 %v115_v15, %s145_s0 }
  0x74   :  { %v8_v16 = vpop.permute.xlu0 %7   ;;  %v20_v17 = vpop.permute.xlu1 %19  }
  0x75   :  { %10 = vst.msk [vmem:[#allocation0] sm:$0x1] %vm9_vm1, %v8_v16  }
  0x78   :  { %v14_v18 = vpop.permute.xlu0 %13   ;;  %v26_v19 = vpop.permute.xlu1 %25  }
  0x79   :  { %16 = vst.msk [vmem:[#allocation0] sm:$0x1] %vm15_vm2, %v14_v18  }
  0x7a   :  { %22 = vst.msk [vmem:[#allocation0] sm:$0x1] %vm21_vm3, %v20_v17  }
  0x7b   :  { %28 = vst.msk [vmem:[#allocation0] sm:$0x1] %vm27_vm4, %v26_v19  }
  0x7c   :  { %v32_v20 = vpop.permute.xlu0 %31   ;;  %v38_v21 = vpop.permute.xlu1 %37  }
  0x7d   :  { %34 = vst.msk [vmem:[#allocation0] sm:$0x1] %vm33_vm5, %v32_v20  }
  0x7e   :  { %40 = vst.msk [vmem:[#allocation0] sm:$0x1] %vm39_vm6, %v38_v21  }
  0x80   :  { %v44_v22 = vpop.permute.xlu0 %43   ;;  %v50_v23 = vpop.permute.xlu1 %49  }
  0x81   :  { %46 = vst.msk [vmem:[#allocation0] sm:$0x1] %vm45_vm7, %v44_v22  }
  0x82   :  { %52 = vst.msk [vmem:[#allocation0] sm:$0x1] %vm51_vm8, %v50_v23  }
  0x84   :  { %v56_v24 = vpop.permute.xlu0 %55   ;;  %v62_v25 = vpop.permute.xlu1 %61  }
  0x85   :  { %58 = vst.msk [vmem:[#allocation0] sm:$0x1] %vm57_vm9, %v56_v24  }
  0x86   :  { %64 = vst.msk [vmem:[#allocation0] sm:$0x1] %vm63_vm10, %v62_v25  }
  0x88   :  { %v68_v26 = vpop.permute.xlu0 %67   ;;  %v74_v27 = vpop.permute.xlu1 %73  }
  0x89   :  { %70 = vst.msk [vmem:[#allocation0] sm:$0x1] %vm69_vm11, %v68_v26  }
  0x8a   :  { %76 = vst.msk [vmem:[#allocation0] sm:$0x1] %vm75_vm12, %v74_v27  }
  0x8c   :  { %v80_v28 = vpop.permute.xlu0 %79   ;;  %v86_v29 = vpop.permute.xlu1 %85  }
  0x8d   :  { %82 = vst.msk [vmem:[#allocation0] sm:$0x1] %vm81_vm13, %v80_v28  }
  0x8e   :  { %88 = vst.msk [vmem:[#allocation0] sm:$0x1] %vm87_vm14, %v86_v29  }
  0x90   :  { %v92_v30 = vpop.permute.xlu0 %91  }
  0x91   :  { %94 = vst.msk [vmem:[#allocation0] sm:$0x1] %vm93_vm15, %v92_v30  }
  0x98   :  { %v98_v31 = vld [vmem:[#allocation0] sm:$0x1] }
  0x99   :  { %100 = vst [vmem:[%s208_s1] sm:$0x1] %v98_v31 }

// kernel: residual_block1_forward.1
= control target key start
LH: loop header
LB: loop body
LE: loop exit
PB: predicated region body
PF: predicated region fallthrough
CT: control target
= control target key end

     0   :  { %v43_v0 = vlaneseq  ;;  %v1121_v4 = vmov 0   ;;  %s1122_s27 = smov 64   ;;  %vm89_vm0 = vcmask 1046528   ;;  %vm134_vm2 = vcmask 523264   ;;  %s1124_s12 = smov 16   ;;  %s1526_s0 = inlined_call_operand.vmem [shape: f32[32,64], index: 0, kind: input, shape index: {}]   ;;  %s1527_s1 = inlined_call_operand.vmem [shape: bf16[192,128], index: 1, kind: input, shape index: {}]   ;;  %s1528_s2 = inlined_call_operand.vmem [shape: f32[1,128], index: 2, kind: input, shape index: {}]   ;;  %s1529_s5 = inlined_call_operand.vmem [shape: bf16[384,128], index: 5, kind: input, shape index: {}]   ;;  %s1530_s3 = inlined_call_operand.vmem [shape: f32[1,128], index: 3, kind: input, shape index: {}]   ;;  %s1531_s4 = inlined_call_operand.vmem [shape: f32[1,128], index: 4, kind: input, shape index: {}]   ;;  %s1532_s6 = inlined_call_operand.vmem [shape: f32[1,128], index: 6, kind: input, shape index: {}]   ;;  %s1533_s9 = inlined_call_operand.vmem [shape: bf16[64,128], index: 9, kind: input, shape index: {}]   ;;  %s1534_s7 = inlined_call_operand.vmem [shape: f32[1,128], index: 7, kind: input, shape index: {}]   ;;  %s1535_s8 = inlined_call_operand.vmem [shape: f32[1,128], index: 8, kind: input, shape index: {}]   ;;  %s1536_s10 = inlined_call_operand.vmem [shape: f32[1,128], index: 10, kind: input, shape index: {}]   ;;  %s1537_s11 = inlined_call_operand.vmem [shape: f32[32,128], index: 11, kind: output, shape index: {}]  }
   0x1   :  { %v1190_v1 = vld [vmem:[%s1526_s0] sm:$0xff]  ;;  %v1195_v2 = vld [vmem:[%s1526_s0 + $0x8] sm:$0xff]  ;;  %v1200_v3 = vld [vmem:[%s1526_s0 + $0x10] sm:$0xff]  ;;  %252 = vmatprep.subr.bf16.mxu0 %v1121_v4  ;;  %vm56_vm3 = vcmask 1040384   ;;  %s1125_s13 = smov 32   ;;  %vm1126_vm11 = vmmov 1  }
   0x2   :  { %v1067_v5 = vpack.i.bf16 %v1195_v2, %v1190_v1  ;;  %v1208_v6 = vld [vmem:[%s1526_s0 + $0x18] sm:$0xff]  ;;  %v1077_v7 = vld [vmem:[%s1527_s1] sm:$0xff]   ;;  %v1078_v10 = vld [vmem:[%s1527_s1 + $0x8] sm:$0xff]   ;;  %v1221_v11 = vshrl.u32 %v43_v0, 7  ;;  %v90_v13 = vrot.slane %v1190_v1, 1  ;;  %v91_v14 = vrot.slane %v1195_v2, 1 }
   0x3   :  { %v819_v8 = vpack.c.bf16 %v1208_v6, %v1200_v3  ;;  %v1072_v9 = vpack.i.bf16 %v1208_v6, %v1200_v3  ;;  %253 = vmatpush1.bf16.msra.mxu0 %v1077_v7  ;;  %v1079_v15 = vld [vmem:[%s1527_s1 + $0x10] sm:$0xff]   ;;  %v93_v17 = vrot.slane %v1200_v3, 1  ;;  %v1080_v21 = vld [vmem:[%s1527_s1 + $0x18] sm:$0xff]   ;;  %v95_v25 = vrot.slane %v1208_v6, 1  ;;  %v1081_v28 = vld [vmem:[%s1527_s1 + $0x20] sm:$0xff]  }
   0x4   :  { %1068 = vrot.lane.b32.xlu0 %v1067_v5, %s1122_s27  ;;  %254 = vmatprep.subr.bf16.mxu0 %v1121_v4  ;;  %v45_v12 = vadd.s32 8, %v1221_v11  ;;  %v92_v19 = vsel %vm89_vm0, %v90_v13, %v91_v14  ;;  %v47_v24 = vadd.s32 24, %v1221_v11  ;;  %v60_v26 = vrot.slane %v1200_v3, 7  ;;  %v1082_v34 = vld [vmem:[%s1527_s1 + $0x28] sm:$0xff]   ;;  %v1083_v37 = vld [vmem:[%s1527_s1 + $0x30] sm:$0xff]   ;;  %v1084_v38 = vld [vmem:[%s1527_s1 + $0x38] sm:$0xff]  }
   0x5   :  { %v94_v20 = vsel %vm89_vm0, %v91_v14, %v93_v17  ;;  %v62_v27 = vrot.slane %v1208_v6, 7  ;;  %v96_v30 = vsel %vm89_vm0, %v93_v17, %v95_v25  ;;  %v101_v31 = vsel %vm89_vm0, %v95_v25, 0.0  ;;  %v1085_v39 = vld [vmem:[%s1527_s1 + $0x40] sm:$0xff]   ;;  %v1086_v40 = vld [vmem:[%s1527_s1 + $0x48] sm:$0xff]   ;;  %v1087_v41 = vld [vmem:[%s1527_s1 + $0x50] sm:$0xff]  }
   0x6   :  { %v49_v16 = vand.u32 15, %v45_v12  ;;  %v51_v29 = vand.u32 15, %v47_v24  ;;  %v1088_v42 = vld [vmem:[%s1527_s1 + $0x58] sm:$0xff]   ;;  %v48_v43 = vand.u32 15, %v1221_v11  ;;  %v46_v44 = vadd.s32 16, %v1221_v11 }
   0x7   :  { %255 = vmatpush1.bf16.msra.mxu0 %v1078_v10  ;;  %v63_v33 = vsel %vm56_vm3, %v60_v26, %v62_v27  ;;  %v57_v45 = vrot.slane %v1190_v1, 7  ;;  %v58_v48 = vrot.slane %v1195_v2, 7  ;;  %v926_v10 = vld [vmem:[%s1528_s2] ss:$0 sm:$0xff]  ;;  %s1123_s2 = smov 8  }
   0x8   :  { %1073 = vrot.lane.b32.xlu0 %v1072_v9, %s1122_s27  ;;  %256 = vmatprep.subr.bf16.mxu0 %v1121_v4  ;;  %v1233_v18 = vadd.s32 1, %v49_v16  ;;  %v1255_v32 = vadd.s32 1, %v51_v29  ;;  %v1292_v46 = vadd.s32 4294967295, %v48_v43  ;;  %v50_v47 = vand.u32 15, %v46_v44 }
   0x9   :  { %v68_v49 = vsel %vm56_vm3, 0.0, %v57_v45  ;;  %v59_v52 = vsel %vm56_vm3, %v57_v45, %v58_v48  ;;  %v61_v56 = vsel %vm56_vm3, %v58_v48, %v60_v26 }
   0xa   :  { %vm111_vm1 = vcmp.lt.s32.totalorder %v1233_v18, 16  ;;  %vm113_vm4 = vcmp.lt.s32.totalorder %v1255_v32, 16  ;;  %vm73_vm5 = vcmp.ge.s32.totalorder %v1292_v46, 0  ;;  %v1297_v50 = vadd.s32 4294967295, %v50_v47  ;;  %v1107_v46 = vld [vmem:[%s1529_s5 + $0x90] sm:$0xff]   ;;  %v1110_v18 = vld [vmem:[%s1529_s5 + $0xa8] sm:$0xff]  }
   0xb   :  { %257 = vmatpush1.bf16.msra.mxu0 %v1079_v15  ;;  %v119_v22 = vsel %vm111_vm1, %v94_v20, 0.0  ;;  %v121_v35 = vsel %vm113_vm4, %v101_v31, 0.0  ;;  %v85_v53 = vsel %vm73_vm5, %v68_v49, 0.0  ;;  %vm966_vm12 = vmpackc.low %vm1126_vm11, %vm73_vm5 }
   0xc   :  { %258 = vmatprep.subr.bf16.mxu0 %v1121_v4  ;;  %v140_v23 = vpack.c.bf16 %v119_v22, %v92_v19  ;;  %v142_v36 = vpack.c.bf16 %v121_v35, %v96_v30  ;;  %vm75_vm6 = vcmp.ge.s32.totalorder %v1297_v50, 0  ;;  %vm972_vm14 = vmpackc.low %vm111_vm1, %vm1126_vm11  ;;  %v1109_v50 = vld [vmem:[%s1529_s5 + $0xa0] sm:$0xff]  }
   0xd   :  { %v87_v61 = vsel %vm75_vm6, %v61_v56, 0.0  ;;  %v1089_v56 = vld [vmem:[%s1529_s5 + $0x40] sm:$0xff]   ;;  %vm969_vm13 = vmpackc.low %vm1126_vm11, %vm75_vm6 }
   0xe   :  { %939 = vmatprep.mubr.msk.bf16.mxu0 %vm134_vm2, %v140_v23  ;;  %985 = vmatprep.subr.bf16.mxu1 %v1089_v56  ;;  %vm975_vm15 = vmpackc.low %vm113_vm4, %vm1126_vm11 }
   0xf   :  { %259 = vmatpush1.bf16.msra.mxu0 %v1080_v21 }
  0x10   :  { %260 = vmatprep.subr.bf16.mxu0 %v1121_v4 }
  0x13   :  { %261 = vmatpush1.bf16.msra.mxu0 %v1081_v28 }
  0x14   :  { %262 = vmatprep.subr.bf16.mxu0 %v1121_v4 }
  0x17   :  { %263 = vmatpush1.bf16.msra.mxu0 %v1082_v34 }
  0x18   :  { %264 = vmatprep.subr.bf16.mxu0 %v1121_v4 }
  0x1b   :  { %265 = vmatpush1.bf16.msra.mxu0 %v1083_v37 }
  0x1c   :  { %266 = vmatprep.subr.bf16.mxu0 %v1121_v4 }
  0x1f   :  { %267 = vmatpush1.bf16.msra.mxu0 %v1084_v38 }
  0x20   :  { %268 = vmatprep.subr.bf16.mxu0 %v1121_v4 }
  0x23   :  { %269 = vmatpush1.bf16.msra.mxu0 %v1085_v39 }
  0x24   :  { %270 = vmatprep.subr.bf16.mxu0 %v1121_v4 }
  0x27   :  { %271 = vmatpush1.bf16.msra.mxu0 %v1086_v40 }
  0x28   :  { %272 = vmatprep.subr.bf16.mxu0 %v1121_v4 }
  0x2b   :  { %273 = vmatpush1.bf16.msra.mxu0 %v1087_v41 }
  0x2c   :  { %274 = vmatprep.subr.bf16.mxu0 %v1121_v4 }
  0x2f   :  { %275 = vmatpush1.bf16.msra.mxu0 %v1088_v42 }
  0x76   :  { %v1069_v51 = vpop.permute.xlu0 %1068 }
  0x77   :  { %v1071_v54 = vunpack.i.h.bf16 %v1069_v51  ;;  %v1070_v55 = vunpack.i.l.bf16 %v1069_v51 }
  0x79   :  { %v135_v57 = vsel %vm134_vm2, %v85_v53, %v1070_v55  ;;  %v136_v58 = vsel %vm134_vm2, %v59_v52, %v1071_v54 }
  0x7a   :  { %v139_v59 = vpack.c.bf16 %v136_v58, %v135_v57  ;;  %v1074_v60 = vpop.permute.xlu0 %1073  ;;  %v1090_v57 = vld [vmem:[%s1529_s5] sm:$0xff]  }
  0x7b   :  { %v1076_v62 = vunpack.i.h.bf16 %v1074_v60  ;;  %v1075_v63 = vunpack.i.l.bf16 %v1074_v60  ;;  %986 = vmatpush3.bf16.msra.mxu1 %v1090_v57 }
  0x7c   :  { %285 = vmatmul.mubr.bf16.vlgmr.msra.gmra.mrb[0].mxu0 %v139_v59  ;;  %v1091_v59 = vld [vmem:[%s1529_s5 + $0x48] sm:$0xff]  }
  0x7d   :  { %940 = vmatprep.mubr.msk.bf16.mxu0 %vm134_vm2, %v142_v36  ;;  %v137_v0 = vsel %vm134_vm2, %v87_v61, %v1075_v63  ;;  %v138_v4 = vsel %vm134_vm2, %v63_v33, %v1076_v62  ;;  %v1092_v61 = vld [vmem:[%s1529_s5 + $0x8] sm:$0xff]   ;;  %987 = vmatprep.subr.bf16.mxu1 %v1091_v59  ;;  %v1093_v63 = vld [vmem:[%s1529_s5 + $0x50] sm:$0xff]  }
  0x7e   :  { %v141_v5 = vpack.c.bf16 %v138_v4, %v137_v0  ;;  %v1094_v4 = vld [vmem:[%s1529_s5 + $0x10] sm:$0xff]  }
  0x7f   :  { %988 = vmatpush3.bf16.msra.mxu1 %v1092_v61 }
  0x80   :  { %989 = vmatprep.subr.bf16.mxu1 %v1093_v63 }
  0x83   :  { %990 = vmatpush3.bf16.msra.mxu1 %v1094_v4 }
  0x84   :  { %293 = vmatmul.mubr.bf16.gmra.mrb[4].mxu0 %v141_v5  ;;  %v1095_v5 = vld [vmem:[%s1529_s5 + $0x58] sm:$0xff]  }
  0x85   :  { %991 = vmatprep.subr.bf16.mxu1 %v1095_v5 }
 0x14f   :  { %v286_v7 = vpop.f32.mrb[0].mxu0 }
 0x150   :  { %v288_v9 = vpop.f32.mrb[1].mxu0  ;;  %v1316_v15 = vadd.f32 %v926_v10, %v286_v7  ;;  %v1096_v7 = vld [vmem:[%s1529_s5 + $0x18] sm:$0xff]  }
 0x151   :  { %v289_v12 = vpop.f32.mrb[2].mxu0  ;;  %992 = vmatpush3.bf16.msra.mxu1 %v1096_v7  ;;  %v1097_v9 = vld [vmem:[%s1529_s5 + $0x60] sm:$0xff]  }
 0x152   :  { %v1314_v13 = vadd.f32 %v926_v10, %v289_v12  ;;  %v291_v14 = vpop.f32.mrb[3].mxu0  ;;  %v324_v19 = vmul.f32 %v1316_v15, %v1316_v15  ;;  %993 = vmatprep.subr.bf16.mxu1 %v1097_v9  ;;  %v1099_v12 = vld [vmem:[%s1529_s5 + $0x68] sm:$0xff]  }
 0x153   :  { %v1100_v14 = vld [vmem:[%s1529_s5 + $0x28] sm:$0xff]  }
 0x154   :  { %v325_v16 = vmul.f32 %v1314_v13, %v1314_v13  ;;  %v303_v20 = vadd.f32 %v1314_v13, %v1316_v15 }
 0x156   :  { %v328_v24 = vadd.f32 %v325_v16, %v324_v19  ;;  %v1101_v16 = vld [vmem:[%s1529_s5 + $0x70] sm:$0xff]   ;;  %v1103_v19 = vld [vmem:[%s1529_s5 + $0x78] sm:$0xff]  }
 0x157   :  { %v294_v17 = vpop.f32.mrb[4].mxu0 }
 0x158   :  { %v1324_v21 = vadd.f32 %v926_v10, %v294_v17  ;;  %v296_v22 = vpop.f32.mrb[5].mxu0  ;;  %v1102_v17 = vld [vmem:[%s1529_s5 + $0x30] sm:$0xff]  }
 0x159   :  { %v297_v23 = vpop.f32.mrb[6].mxu0  ;;  %v1105_v22 = vld [vmem:[%s1529_s5 + $0x80] sm:$0xff]  }
 0x15a   :  { %v304_v25 = vadd.f32 %v303_v20, %v1324_v21  ;;  %v326_v26 = vmul.f32 %v1324_v21, %v1324_v21  ;;  %v1329_v27 = vadd.f32 %v926_v10, %v297_v23  ;;  %v299_v28 = vpop.f32.mrb[7].mxu0  ;;  %v1098_v10 = vld [vmem:[%s1529_s5 + $0x20] sm:$0xff]   ;;  %v1104_v20 = vld [vmem:[%s1529_s5 + $0x38] sm:$0xff]  }
 0x15b   :  { %994 = vmatpush3.bf16.msra.mxu1 %v1098_v10 }
 0x15c   :  { %v329_v29 = vadd.f32 %v328_v24, %v326_v26  ;;  %v305_v30 = vadd.f32 %v304_v25, %v1329_v27  ;;  %v327_v31 = vmul.f32 %v1329_v27, %v1329_v27  ;;  %995 = vmatprep.subr.bf16.mxu1 %v1099_v12 }
 0x15e   :  { %v306_v33 = vrot.slane %v305_v30, 4  ;;  %v330_v34 = vadd.f32 %v329_v29, %v327_v31 }
 0x15f   :  { %996 = vmatpush3.bf16.msra.mxu1 %v1100_v14 }
 0x160   :  { %v331_v35 = vrot.slane %v330_v34, 4  ;;  %v307_v36 = vadd.f32 %v306_v33, %v305_v30  ;;  %997 = vmatprep.subr.bf16.mxu1 %v1101_v16 }
 0x162   :  { %v308_v37 = vrot.slane %v307_v36, 2  ;;  %v332_v38 = vadd.f32 %v331_v35, %v330_v34  ;;  %v301_v34 = vld [vmem:[%s1530_s3] sm:$0x1]  ;;  %v1397_v35 = vsub.s32 0, %v1221_v11 }
 0x163   :  { %998 = vmatpush3.bf16.msra.mxu1 %v1102_v17 }
 0x164   :  { %v309_v39 = vadd.f32 %v308_v37, %v307_v36  ;;  %v333_v40 = vrot.slane %v332_v38, 2  ;;  %999 = vmatprep.subr.bf16.mxu1 %v1103_v19  ;;  %v1108_v19 = vld [vmem:[%s1529_s5 + $0x98] sm:$0xff]  }
 0x166   :  { %v310_v41 = vrot.slane %v309_v39, 1  ;;  %v334_v42 = vadd.f32 %v333_v40, %v332_v38  ;;  %v302_v38 = vld [vmem:[%s1531_s4] sm:$0x1] }
 0x167   :  { %1000 = vmatpush3.bf16.msra.mxu1 %v1104_v20 }
 0x168   :  { %v311_v43 = vadd.f32 %v310_v41, %v309_v39  ;;  %v335_v44 = vrot.slane %v334_v42, 1  ;;  %1029 = vmatprep.subr.bf16.mxu1 %v1105_v22 }
 0x16a   :  { %312 = vrot.lane.b32.xlu1 %v311_v43, %s1123_s2  ;;  %v336_v45 = vadd.f32 %v335_v44, %v334_v42 }
 0x16e   :  { %337 = vrot.lane.b32.xlu1 %v336_v45, %s1123_s2 }
 0x1dc   :  { %v313_v47 = vpop.permute.xlu1 %312 }
 0x1dd   :  { %v314_v48 = vadd.f32 %v313_v47, %v311_v43 }
 0x1df   :  { %315 = vrot.lane.b32.xlu0 %v314_v48, %s1124_s12 }
 0x1e0   :  { %v338_v49 = vpop.permute.xlu1 %337 }
 0x1e1   :  { %v339_v51 = vadd.f32 %v338_v49, %v336_v45 }
 0x1e3   :  { %340 = vrot.lane.b32.xlu1 %v339_v51, %s1124_s12 }
 0x251   :  { %v316_v52 = vpop.permute.xlu0 %315 }
 0x252   :  { %v317_v53 = vadd.f32 %v316_v52, %v314_v48 }
 0x254   :  { %318 = vrot.lane.b32.xlu0 %v317_v53, %s1125_s13 }
 0x255   :  { %v341_v54 = vpop.permute.xlu1 %340 }
 0x256   :  { %v342_v55 = vadd.f32 %v341_v54, %v339_v51 }
 0x258   :  { %343 = vrot.lane.b32.xlu1 %v342_v55, %s1125_s13 }
 0x2c6   :  { %v319_v58 = vpop.permute.xlu0 %318 }
 0x2c7   :  { %v320_v60 = vadd.f32 %v319_v58, %v317_v53 }
 0x2c9   :  { %321 = vrot.lane.b32.xlu0 %v320_v60, %s1122_s27 }
 0x2ca   :  { %v344_v62 = vpop.permute.xlu1 %343 }
 0x2cb   :  { %v345_v0 = vadd.f32 %v344_v62, %v342_v55  ;;  %v1106_v62 = vld [vmem:[%s1529_s5 + $0x88] sm:$0xff]  }
 0x2cd   :  { %346 = vrot.lane.b32.xlu1 %v345_v0, %s1122_s27 }
 0x33b   :  { %v322_v23 = vpop.permute.xlu0 %321 }
 0x33c   :  { %v323_v24 = vadd.f32 %v322_v23, %v320_v60  ;;  %v1112_v23 = vld [vmem:[%s1529_s5 + $0xb8] sm:$0xff]  }
 0x33e   :  { %v349_v25 = vmul.f32 0.001953125, %v323_v24 }
 0x33f   :  { %v347_v26 = vpop.permute.xlu1 %346 }
 0x340   :  { %v348_v28 = vadd.f32 %v347_v26, %v345_v0  ;;  %v351_v29 = vmul.f32 %v349_v25, %v349_v25 }
 0x342   :  { %v350_v30 = vmul.f32 0.001953125, %v348_v28 }
 0x344   :  { %v352_v31 = vsub.f32 %v350_v30, %v351_v29 }
 0x346   :  { %v353_v33 = vadd.f32 1e-05, %v352_v31 }
 0x348   :  { %1117 = vrsqrt.f32 %v353_v33 }
 0x352   :  { %v1118_v36 = vpop.eup %1117 }
 0x353   :  { %v355_v37 = vmul.f32 %v1118_v36, %v301_v34 }
 0x355   :  { %v356_v39 = vmul.f32 %v355_v37, %v349_v25  ;;  %v362_v40 = vrot.slane %v355_v37, %v1397_v35 }
 0x357   :  { %v357_v41 = vsub.f32 %v302_v38, %v356_v39  ;;  %v364_v42 = vmul.f32 %v362_v40, %v1316_v15  ;;  %v365_v43 = vmul.f32 %v362_v40, %v1314_v13  ;;  %v366_v45 = vmul.f32 %v362_v40, %v1324_v21 }
 0x358   :  { %v367_v11 = vmul.f32 %v362_v40, %v1329_v27 }
 0x359   :  { %v372_v44 = vrot.slane %v357_v41, %v1397_v35 }
 0x35b   :  { %v374_v47 = vadd.f32 %v372_v44, %v364_v42  ;;  %v375_v48 = vadd.f32 %v372_v44, %v365_v43  ;;  %v376_v49 = vadd.f32 %v372_v44, %v366_v45  ;;  %v377_v51 = vadd.f32 %v372_v44, %v367_v11  ;;  %v941_v43 = vld [vmem:[%s1532_s6] ss:$0 sm:$0xff] }
 0x35d   :  { %vm378_vm7 = vcmp.gt.f32.partialorder %v374_v47, 0.0  ;;  %vm379_vm8 = vcmp.gt.f32.partialorder %v375_v48, 0.0  ;;  %v382_v52 = vmul.f32 0.01, %v374_v47  ;;  %v383_v53 = vmul.f32 0.01, %v375_v48 }
 0x35e   :  { %vm380_vm9 = vcmp.gt.f32.partialorder %v376_v49, 0.0  ;;  %vm381_vm10 = vcmp.gt.f32.partialorder %v377_v51, 0.0  ;;  %v384_v54 = vmul.f32 0.01, %v376_v49  ;;  %v385_v15 = vmul.f32 0.01, %v377_v51 }
 0x35f   :  { %v386_v55 = vsel %vm378_vm7, %v374_v47, %v382_v52  ;;  %v387_v13 = vsel %vm379_vm8, %v375_v48, %v383_v53 }
 0x360   :  { %v394_v56 = vrot.slane %v386_v55, 7  ;;  %v395_v57 = vrot.slane %v387_v13, 7  ;;  %v427_v58 = vpack.c.bf16 %v387_v13, %v386_v55  ;;  %v388_v21 = vsel %vm380_vm9, %v376_v49, %v384_v54 }
 0x361   :  { %v389_v59 = vsel %vm381_vm10, %v377_v51, %v385_v15  ;;  %v397_v63 = vrot.slane %v388_v21, 7  ;;  %v410_v5 = vrot.slane %v386_v55, 1  ;;  %v411_v7 = vrot.slane %v387_v13, 1 }
 0x362   :  { %v405_v27 = vsel %vm56_vm3, 0.0, %v394_v56  ;;  %v396_v60 = vsel %vm56_vm3, %v394_v56, %v395_v57  ;;  %663 = vmatprep.mubr.bf16.mxu1 %v427_v58  ;;  %v399_v0 = vrot.slane %v389_v59, 7  ;;  %v430_v4 = vpack.c.bf16 %v389_v59, %v388_v21 }
 0x363   :  { %v967_v61 = vpack.c.bf16 %v396_v60, %v405_v27  ;;  %v413_v9 = vrot.slane %v388_v21, 1  ;;  %v398_v10 = vsel %vm56_vm3, %v395_v57, %v397_v63  ;;  %v412_v14 = vsel %vm89_vm0, %v410_v5, %v411_v7 }
 0x364   :  { %v400_v12 = vsel %vm56_vm3, %v397_v63, %v399_v0  ;;  %v415_v24 = vrot.slane %v389_v59, 1 }
 0x365   :  { %968 = vmatmul.mubr.msk.bf16.vlgmr.msra.gmra.mrb[0].mxu1 %vm966_vm12, %v967_v61  ;;  %v414_v16 = vsel %vm89_vm0, %v411_v7, %v413_v9  ;;  %v970_v17 = vpack.c.bf16 %v400_v12, %v398_v10 }
 0x366   :  { %1030 = vmatpush3.bf16.msra.mxu1 %v1105_v22  ;;  %671 = vmatprep.mubr.bf16.mxu1 %v430_v4  ;;  %v973_v20 = vpack.c.bf16 %v414_v16, %v412_v14  ;;  %v1111_v22 = vld [vmem:[%s1529_s5 + $0xb0] sm:$0xff]   ;;  %v416_v25 = vsel %vm89_vm0, %v413_v9, %v415_v24  ;;  %v421_v26 = vsel %vm89_vm0, %v415_v24, 0.0 }
 0x367   :  { %1031 = vmatprep.subr.bf16.mxu1 %v1106_v62  ;;  %v976_v28 = vpack.c.bf16 %v421_v26, %v416_v25 }
 0x36a   :  { %1032 = vmatpush3.bf16.msra.mxu1 %v1106_v62 }
 0x36b   :  { %1033 = vmatprep.subr.bf16.mxu1 %v1107_v46 }
 0x36d   :  { %971 = vmatmul.mubr.msk.bf16.gmra.mrb[4].mxu1 %vm969_vm13, %v970_v17  ;;  %v818_v17 = vpack.c.bf16 %v1195_v2, %v1190_v1 }
 0x36e   :  { %1034 = vmatpush3.bf16.msra.mxu1 %v1107_v46  ;;  %1045 = vmatprep.mubr.msk.bf16.mxu1 %vm972_vm14, %v973_v20  ;;  %v1114_v20 = vld [vmem:[%s1533_s9 + $0x8] sm:$0xff]  }
 0x36f   :  { %1035 = vmatprep.subr.bf16.mxu1 %v1108_v19  ;;  %1057 = vmatprep.mubr.msk.bf16.mxu0 %vm134_vm2, %v818_v17 }
 0x372   :  { %1036 = vmatpush3.bf16.msra.mxu1 %v1108_v19  ;;  %v1113_v19 = vld [vmem:[%s1533_s9] sm:$0xff]  }
 0x373   :  { %1037 = vmatprep.subr.bf16.mxu1 %v1109_v50  ;;  %1049 = vmatprep.subr.bf16.mxu0 %v1113_v19 }
 0x374   :  { %1050 = vmatpush3.bf16.msra.mxu0 %v1113_v19 }
 0x375   :  { %1051 = vmatprep.subr.bf16.mxu0 %v1114_v20 }
 0x376   :  { %1038 = vmatpush3.bf16.msra.mxu1 %v1109_v50  ;;  %v1115_v50 = vld [vmem:[%s1533_s9 + $0x10] sm:$0xff]  }
 0x377   :  { %1039 = vmatprep.subr.bf16.mxu1 %v1110_v18 }
 0x378   :  { %1052 = vmatpush3.bf16.msra.mxu0 %v1114_v20 }
 0x379   :  { %1053 = vmatprep.subr.bf16.mxu0 %v1115_v50 }
 0x37a   :  { %1040 = vmatpush3.bf16.msra.mxu1 %v1110_v18 }
 0x37b   :  { %1041 = vmatprep.subr.bf16.mxu1 %v1111_v22 }
 0x37c   :  { %1054 = vmatpush3.bf16.msra.mxu0 %v1115_v50 }
 0x37e   :  { %1042 = vmatpush3.bf16.msra.mxu1 %v1111_v22 }
 0x37f   :  { %1043 = vmatprep.subr.bf16.mxu1 %v1112_v23 }
 0x382   :  { %1044 = vmatpush3.bf16.msra.mxu1 %v1112_v23  ;;  %v1116_v23 = vld [vmem:[%s1533_s9 + $0x18] sm:$0xff]  }
 0x383   :  { %1055 = vmatprep.subr.bf16.mxu0 %v1116_v23 }
 0x384   :  { %1056 = vmatpush3.bf16.msra.mxu0 %v1116_v23 }
 0x385   :  { %1046 = vmatmul.mubr.msk.bf16.vlgmr.msra.gmra.mrb[8].mxu1 %vm975_vm15, %v976_v28 }
 0x387   :  { %1058 = vmatmul.mubr.msk.bf16.vlgmr.msra.gmra.mrb[8].mxu0 %vm134_vm2, %v819_v8 }
 0x438   :  { %v1001_v29 = vpop.f32.mrb[0].mxu1 }
 0x439   :  { %v1002_v30 = vpop.f32.mrb[1].mxu1 }
 0x43a   :  { %v1003_v31 = vadd.f32 %v1002_v30, %v1001_v29  ;;  %v1004_v33 = vpop.f32.mrb[2].mxu1 }
 0x43b   :  { %v1005_v34 = vpop.f32.mrb[3].mxu1 }
 0x43c   :  { %v1006_v36 = vadd.f32 %v1005_v34, %v1004_v33  ;;  %v666_v45 = vadd.f32 %v1003_v31, %v941_v43 }
 0x43e   :  { %v669_v52 = vadd.f32 %v1006_v36, %v941_v43 }
 0x440   :  { %v1007_v37 = vpop.f32.mrb[4].mxu1 }
 0x441   :  { %v1008_v38 = vpop.f32.mrb[5].mxu1 }
 0x442   :  { %v1009_v39 = vadd.f32 %v1008_v38, %v1007_v37  ;;  %v1010_v40 = vpop.f32.mrb[6].mxu1 }
 0x443   :  { %v1011_v41 = vpop.f32.mrb[7].mxu1 }
 0x444   :  { %v1012_v42 = vadd.f32 %v1011_v41, %v1010_v40  ;;  %v674_v32 = vadd.f32 %v1009_v39, %v941_v43 }
 0x446   :  { %v677_v48 = vadd.f32 %v1012_v42, %v941_v43 }
 0x458   :  { %v1047_v44 = vpop.f32.mrb[8].mxu1 }
 0x459   :  { %v1452_v11 = vadd.f32 %v1047_v44, %v674_v32  ;;  %v714_v47 = vpop.f32.mrb[9].mxu1  ;;  %v729_v44 = vld [vmem:[%s1534_s7] sm:$0x1] }
 0x45a   :  { %v1454_v49 = vadd.f32 %v714_v47, %v666_v45  ;;  %v1048_v51 = vpop.f32.mrb[10].mxu1  ;;  %v1059_v34 = vpop.f32.mrb[8].mxu0 }
 0x45b   :  { %v1456_v53 = vadd.f32 %v1048_v51, %v677_v48  ;;  %v717_v54 = vpop.f32.mrb[11].mxu1  ;;  %v754_v57 = vmul.f32 %v1452_v11, %v1452_v11  ;;  %v899_v3 = vpop.f32.mrb[9].mxu0  ;;  %v730_v48 = vld [vmem:[%s1535_s8] sm:$0x1] }
 0x45c   :  { %v1458_v15 = vadd.f32 %v717_v54, %v669_v52  ;;  %v752_v55 = vmul.f32 %v1454_v49, %v1454_v49  ;;  %v1060_v6 = vpop.f32.mrb[10].mxu0 }
 0x45d   :  { %v755_v59 = vmul.f32 %v1456_v53, %v1456_v53  ;;  %v902_v8 = vpop.f32.mrb[11].mxu0 }
 0x45e   :  { %v731_v13 = vadd.f32 %v1458_v15, %v1454_v49  ;;  %v753_v56 = vmul.f32 %v1458_v15, %v1458_v15 }
 0x460   :  { %v732_v58 = vadd.f32 %v731_v13, %v1452_v11  ;;  %v756_v21 = vadd.f32 %v753_v56, %v752_v55  ;;  %v978_v56 = vld [vmem:[%s1536_s10] ss:$0 sm:$0xff] }
 0x462   :  { %v733_v27 = vadd.f32 %v732_v58, %v1456_v53  ;;  %v757_v60 = vadd.f32 %v756_v21, %v754_v57 }
 0x464   :  { %v734_v61 = vrot.slane %v733_v27, 4  ;;  %v758_v62 = vadd.f32 %v757_v60, %v755_v59 }
 0x466   :  { %v735_v63 = vadd.f32 %v734_v61, %v733_v27  ;;  %v759_v0 = vrot.slane %v758_v62, 4 }
 0x468   :  { %v736_v4 = vrot.slane %v735_v63, 2  ;;  %v760_v5 = vadd.f32 %v759_v0, %v758_v62  ;;  %v908_v62 = vadd.f32 %v1059_v34, %v978_v56 }
 0x46a   :  { %v737_v7 = vadd.f32 %v736_v4, %v735_v63  ;;  %v761_v9 = vrot.slane %v760_v5, 2  ;;  %v900_v63 = vadd.f32 %v978_v56, %v899_v3 }
 0x46c   :  { %v738_v46 = vrot.slane %v737_v7, 1  ;;  %v762_v10 = vadd.f32 %v761_v9, %v760_v5 }
 0x46e   :  { %v739_v12 = vadd.f32 %v738_v46, %v737_v7  ;;  %v763_v14 = vrot.slane %v762_v10, 1  ;;  %v911_v7 = vadd.f32 %v1060_v6, %v978_v56 }
 0x470   :  { %740 = vrot.lane.b32.xlu0 %v739_v12, %s1123_s2  ;;  %v764_v16 = vadd.f32 %v763_v14, %v762_v10 }
 0x472   :  { %765 = vrot.lane.b32.xlu1 %v764_v16, %s1123_s2 }
 0x4e2   :  { %v741_v18 = vpop.permute.xlu0 %740 }
 0x4e3   :  { %v742_v22 = vadd.f32 %v741_v18, %v739_v12 }
 0x4e4   :  { %v766_v1 = vpop.permute.xlu1 %765 }
 0x4e5   :  { %v767_v2 = vadd.f32 %v766_v1, %v764_v16  ;;  %743 = vrot.lane.b32.xlu0 %v742_v22, %s1124_s12 }
 0x4e7   :  { %768 = vrot.lane.b32.xlu1 %v767_v2, %s1124_s12 }
 0x557   :  { %v744_v24 = vpop.permute.xlu0 %743 }
 0x558   :  { %v745_v25 = vadd.f32 %v744_v24, %v742_v22 }
 0x559   :  { %v769_v26 = vpop.permute.xlu1 %768 }
 0x55a   :  { %v770_v28 = vadd.f32 %v769_v26, %v767_v2  ;;  %746 = vrot.lane.b32.xlu0 %v745_v25, %s1125_s13 }
 0x55c   :  { %771 = vrot.lane.b32.xlu1 %v770_v28, %s1125_s13 }
 0x5cc   :  { %v747_v29 = vpop.permute.xlu0 %746 }
 0x5cd   :  { %v748_v30 = vadd.f32 %v747_v29, %v745_v25 }
 0x5ce   :  { %v772_v31 = vpop.permute.xlu1 %771 }
 0x5cf   :  { %v773_v33 = vadd.f32 %v772_v31, %v770_v28  ;;  %749 = vrot.lane.b32.xlu0 %v748_v30, %s1122_s27 }
 0x5d1   :  { %774 = vrot.lane.b32.xlu1 %v773_v33, %s1122_s27 }
 0x641   :  { %v750_v36 = vpop.permute.xlu0 %749 }
 0x642   :  { %v751_v37 = vadd.f32 %v750_v36, %v748_v30 }
 0x643   :  { %v775_v38 = vpop.permute.xlu1 %774 }
 0x644   :  { %v777_v39 = vmul.f32 0.001953125, %v751_v37  ;;  %v776_v40 = vadd.f32 %v775_v38, %v773_v33 }
 0x646   :  { %v779_v41 = vmul.f32 %v777_v39, %v777_v39  ;;  %v778_v42 = vmul.f32 0.001953125, %v776_v40 }
 0x648   :  { %v780_v43 = vsub.f32 %v778_v42, %v779_v41 }
 0x64a   :  { %v781_v32 = vadd.f32 1e-05, %v780_v43 }
 0x64c   :  { %1119 = vrsqrt.f32 %v781_v32 }
 0x656   :  { %v1120_v45 = vpop.eup %1119 }
 0x657   :  { %v783_v47 = vmul.f32 %v1120_v45, %v729_v44 }
 0x659   :  { %v784_v51 = vmul.f32 %v783_v47, %v777_v39  ;;  %v790_v52 = vrot.slane %v783_v47, %v1397_v35 }
 0x65b   :  { %v785_v54 = vsub.f32 %v730_v48, %v784_v51  ;;  %v794_v55 = vmul.f32 %v790_v52, %v1452_v11  ;;  %v792_v57 = vmul.f32 %v790_v52, %v1454_v49  ;;  %v795_v58 = vmul.f32 %v790_v52, %v1456_v53 }
 0x65c   :  { %v793_v21 = vmul.f32 %v790_v52, %v1458_v15  ;;  %v903_v53 = vadd.f32 %v978_v56, %v902_v8 }
 0x65d   :  { %v800_v13 = vrot.slane %v785_v54, %v1397_v35 }
 0x65f   :  { %v804_v59 = vadd.f32 %v800_v13, %v794_v55  ;;  %v802_v27 = vadd.f32 %v800_v13, %v792_v57  ;;  %v805_v60 = vadd.f32 %v800_v13, %v795_v58  ;;  %v803_v61 = vadd.f32 %v800_v13, %v793_v21 }
 0x661   :  { %vm808_vm0 = vcmp.gt.f32.partialorder %v804_v59, 0.0  ;;  %v812_v11 = vmul.f32 0.01, %v804_v59  ;;  %vm806_vm1 = vcmp.gt.f32.partialorder %v802_v27, 0.0  ;;  %v810_v35 = vmul.f32 0.01, %v802_v27 }
 0x662   :  { %vm809_vm2 = vcmp.gt.f32.partialorder %v805_v60, 0.0  ;;  %v813_v0 = vmul.f32 0.01, %v805_v60  ;;  %vm807_vm3 = vcmp.gt.f32.partialorder %v803_v61, 0.0  ;;  %v811_v4 = vmul.f32 0.01, %v803_v61 }
 0x663   :  { %v816_v5 = vsel %vm808_vm0, %v804_v59, %v812_v11  ;;  %v814_v49 = vsel %vm806_vm1, %v802_v27, %v810_v35 }
 0x664   :  { %v916_v9 = vadd.f32 %v908_v62, %v816_v5  ;;  %v914_v15 = vadd.f32 %v900_v63, %v814_v49  ;;  %v817_v46 = vsel %vm809_vm2, %v805_v60, %v813_v0  ;;  %v815_v10 = vsel %vm807_vm3, %v803_v61, %v811_v4 }
 0x665   :  { %v917_v12 = vadd.f32 %v911_v7, %v817_v46  ;;  %v915_v14 = vadd.f32 %v903_v53, %v815_v10 }
 0x666   :  { %920 = vst [vmem:[%s1537_s11 + $0x10] sm:$0xff] %v916_v9  ;;  %918 = vst [vmem:[%s1537_s11] sm:$0xff] %v914_v15 }
 0x667   :  { %921 = vst [vmem:[%s1537_s11 + $0x18] sm:$0xff] %v917_v12  ;;  %919 = vst [vmem:[%s1537_s11 + $0x8] sm:$0xff] %v915_v14 }

</bundles_post_ra>
